<compile_context>
chip_gen: v5e
topology: v5e:2x2
jax: 0.10.0
libtpu: 0.0.40
codegen_flags: <defaults>
</compile_context>

<pallas_src>
import math

import jax
import jax.numpy as jnp
from jax.experimental import pallas as pl
from jax.experimental.pallas import tpu as pltpu


_MXU_PASS_LANES = 128           # conservative single-pass MXU width (v5e)
_FUSED_ACT_BYTES_MAX = 2 << 20  # past this, the wrapper-side concat is a bad trade
_COMPUTE_DTYPE = jnp.bfloat16   # MXU operand dtype (accumulation stays f32)


def _attention_core(q, k, v, wo_ref, bo_ref, out_ref, mean_ref):
    """Shared attention tail. q/k/v: (bb, S, D) bf16, q pre-scaled by 1/sqrt(D)."""
    bb, S, D = q.shape

    # Scaled dot-product scores: contraction over D, batched over bb.  K is
    # consumed in its stored layout (no XLU transpose, no k.T temporary).
    s = jax.lax.dot_general(q, k, (((2,), (2,)), ((0,), (0,))),
                            preferred_element_type=jnp.float32)       # (bb,S,S)

    # Numerically-stable softmax along the key axis, all in f32 (v5e has no
    # bf16 VPU); the reciprocal runs on the otherwise-idle EUP slot.
    s_max = jnp.max(s, axis=-1, keepdims=True)
    p = jnp.exp(s - s_max)
    p_sum = jnp.sum(p, axis=-1, keepdims=True)
    scores = p * pl.reciprocal(p_sum, approx=True)                    # (bb,S,S) f32

    # Attention context + output projection (bf16 MXU operands, f32 accum).
    ctx = jax.lax.dot_general(scores.astype(v.dtype), v,
                              (((2,), (1,)), ((0,), (0,))),
                              preferred_element_type=jnp.float32)     # (bb,S,D)
    out = jnp.dot(ctx.reshape(bb * S, D).astype(wo_ref.dtype), wo_ref[...],
                  preferred_element_type=jnp.float32) + bo_ref[...]
    # NOTE: at D=32 this store uses 32/128 lanes (vst.msk); padding D to 128 /
    # packing heads in the surrounding model is the remaining big layout lever.
    out_ref[...] = out.reshape(bb, S, D).astype(out_ref.dtype)

    # torch.mean(scores, dim=-2): cross-sublane reduce on the XLU (the MXU is
    # already the busy unit), stored as a lane-dense 2-D (bb, S) slab.
    mean_ref[...] = (jnp.sum(scores, axis=1) * (1.0 / S)).astype(mean_ref.dtype)


def _fused_qkv_kernel(x_ref, wqkv_ref, bqkv_ref, wo_ref, bo_ref,
                      out_ref, mean_ref):
    """One (bb*S, 3D) @ (3D, 3D) projection; valid while 3D fits one MXU pass."""
    bb, S, three_d = x_ref.shape
    D = three_d // 3

    x = x_ref[...].reshape(bb * S, three_d)
    qkv = jnp.dot(x, wqkv_ref[...],
                  preferred_element_type=jnp.float32) + bqkv_ref[...]
    qkv = qkv.reshape(bb, S, three_d)
    # Sub-128-lane slices: cheap while 3D<=128 (one vreg); large-D problems use
    # the split-projection kernel below instead.
    q = qkv[:, :, :D].astype(_COMPUTE_DTYPE)       # already scaled by 1/sqrt(D)
    k = qkv[:, :, D:2 * D].astype(_COMPUTE_DTYPE)
    v = qkv[:, :, 2 * D:].astype(_COMPUTE_DTYPE)
    _attention_core(q, k, v, wo_ref, bo_ref, out_ref, mean_ref)


def _split_qkv_kernel(q_ref, k_ref, v_ref, wq_ref, wk_ref, wv_ref,
                      bq_ref, bk_ref, bv_ref, wo_ref, bo_ref,
                      out_ref, mean_ref):
    """Three (bb*S, D) @ (D, D) projections — used once 3D exceeds one MXU pass
    (avoids the 3x FLOP / weight-DMA waste of the block-diagonal fusion and the
    wrapper concat's extra pass over HBM)."""
    bb, S, D = q_ref.shape

    def proj(x_ref, w_ref, b_ref):
        y = jnp.dot(x_ref[...].reshape(bb * S, D), w_ref[...],
                    preferred_element_type=jnp.float32) + b_ref[...]
        return y.astype(_COMPUTE_DTYPE).reshape(bb, S, D)

    q = proj(q_ref, wq_ref, bq_ref)             # wq/bq pre-scaled by 1/sqrt(D)
    k = proj(k_ref, wk_ref, bk_ref)
    v = proj(v_ref, wv_ref, bv_ref)
    _attention_core(q, k, v, wo_ref, bo_ref, out_ref, mean_ref)


def _batch_block_size(B, S, D, elem_bytes=2):
    """Batch rows per grid step (size-based, no device sniffing).

    Tiny problems run as ONE grid step: splitting them (e.g. a 2-example batch
    across v7x's two TensorCores) only exposes the input DMA, duplicates the
    weight fetches and pays the ~0.35us/step overhead twice.  Once per-step
    activation traffic is large enough that DMA/compute overlap matters, cap
    the block so the grid has >=2 steps to pipeline (and shard across cores).
    """
    per_example = 4 * S * D * elem_bytes        # q,k,v in + out, per example
    if B * per_example <= (1 << 20):
        return B
    bb = max(1, min(B // 2, (2 << 20) // per_example))
    while B % bb:                               # keep the grid exact
        bb -= 1
    return bb


def self_attention(query, key, value, params):
    """query/key/value: (B, S, D) float32.  params: PyTorch-layout Linear
    weights (out, in) and biases (out,).  Returns (out (B,S,D), mean (B,S))."""
    B, S, D = query.shape
    scale = 1.0 / math.sqrt(float(D))

    bb = _batch_block_size(B, S, D)
    num_steps = B // bb

    wo_t = params["wo"].T.astype(_COMPUTE_DTYPE)                      # (D, D)
    bo2 = params["bo"].reshape(1, D).astype(jnp.float32)              # (1, D)

    out_shape = (jax.ShapeDtypeStruct((B, S, D), jnp.float32),
                 jax.ShapeDtypeStruct((B, S), jnp.float32))
    out_specs = [pl.BlockSpec((bb, S, D), lambda b: (b, 0, 0)),
                 pl.BlockSpec((bb, S), lambda b: (b, 0))]

    w_spec = pl.BlockSpec((D, D), lambda b: (0, 0))
    b_spec = pl.BlockSpec((1, D), lambda b: (0, 0))

    use_fused = (3 * D <= _MXU_PASS_LANES and
                 B * S * 3 * D * 2 <= _FUSED_ACT_BYTES_MAX)

    if use_fused:
        # Block-diagonal fused QKV weight (in, out) with the score scale folded
        # into the Q block; concatenated (Q-scaled) bias; one activation concat
        # so the kernel does a single projection matmul and one input DMA.
        wqkv = jax.scipy.linalg.block_diag(
            params["wq"].T * scale, params["wk"].T, params["wv"].T
        ).astype(_COMPUTE_DTYPE)                                      # (3D, 3D)
        bqkv = jnp.concatenate([params["bq"] * scale, params["bk"],
                                params["bv"]]).reshape(1, 3 * D)
        bqkv = bqkv.astype(jnp.float32)                               # (1, 3D)
        x_cat = jnp.concatenate([query, key, value],
                                axis=-1).astype(_COMPUTE_DTYPE)       # (B,S,3D)
        kernel = _fused_qkv_kernel
        args = (x_cat, wqkv, bqkv, wo_t, bo2)
        in_specs = [
            pl.BlockSpec((bb, S, 3 * D), lambda b: (b, 0, 0)),
            pl.BlockSpec((3 * D, 3 * D), lambda b: (0, 0)),
            pl.BlockSpec((1, 3 * D), lambda b: (0, 0)),
            w_spec,
            b_spec,
        ]
    else:
        wq = (params["wq"].T * scale).astype(_COMPUTE_DTYPE)
        wk = params["wk"].T.astype(_COMPUTE_DTYPE)
        wv = params["wv"].T.astype(_COMPUTE_DTYPE)
        bq = (params["bq"] * scale).reshape(1, D).astype(jnp.float32)
        bk = params["bk"].reshape(1, D).astype(jnp.float32)
        bv = params["bv"].reshape(1, D).astype(jnp.float32)
        kernel = _split_qkv_kernel
        args = (query.astype(_COMPUTE_DTYPE), key.astype(_COMPUTE_DTYPE),
                value.astype(_COMPUTE_DTYPE), wq, wk, wv, bq, bk, bv, wo_t, bo2)
        act_spec = pl.BlockSpec((bb, S, D), lambda b: (b, 0, 0))
        in_specs = [act_spec, act_spec, act_spec,
                    w_spec, w_spec, w_spec,
                    b_spec, b_spec, b_spec,
                    w_spec, b_spec]

    out, mean_scores = pl.pallas_call(
        kernel,
        out_shape=out_shape,
        grid_spec=pltpu.PrefetchScalarGridSpec(
            num_scalar_prefetch=0,
            grid=(num_steps,),
            in_specs=in_specs,
            out_specs=out_specs,
        ),
        compiler_params=pltpu.CompilerParams(
            dimension_semantics=(
                ("parallel" if num_steps > 1 else "arbitrary"),)),
    )(*args)

    # Dropout is identity in inference mode.
    return out, mean_scores


def reference(query, key, value, params):
    """Pure-JAX f32 reference mirroring the PyTorch forward (eval mode)."""
    D = query.shape[-1]
    q = query @ params["wq"].T + params["bq"]
    k = key @ params["wk"].T + params["bk"]
    v = value @ params["wv"].T + params["bv"]
    s = (q @ jnp.swapaxes(k, -2, -1)) / math.sqrt(D)
    scores = jax.nn.softmax(s, axis=-1)
    x = scores @ v
    x = x @ params["wo"].T + params["bo"]
    return x, jnp.mean(scores, axis=-2)


def _make_params(key, D):
    """Deterministic Linear params in PyTorch layout: W is (out, in), b (out,)."""
    lim = 1.0 / math.sqrt(D)
    names = ["wq", "bq", "wk", "bk", "wv", "bv", "wo", "bo"]
    ks = jax.random.split(key, len(names))
    return {n: jax.random.uniform(ks[i], (D, D) if n.startswith("w") else (D,),
                                  jnp.float32, -lim, lim)
            for i, n in enumerate(names)}


if __name__ == "__main__":
    root = jax.random.PRNGKey(0)
    B, S = 2, 8

    # D=32 exercises the fused-QKV path (3D <= 128); D=256 (the module's
    # default d_dim) exercises the split-projection path.
    for case, D in enumerate((32, 256)):
        ks = jax.random.split(jax.random.fold_in(root, case), 4)
        query = jax.random.normal(ks[0], (B, S, D), jnp.float32)
        key_in = jax.random.normal(ks[1], (B, S, D), jnp.float32)
        value = jax.random.normal(ks[2], (B, S, D), jnp.float32)
        params = _make_params(ks[3], D)

        out, mean_scores = self_attention(query, key_in, value, params)
        jax.block_until_ready((out, mean_scores))

        ref_out, ref_mean = reference(query, key_in, value, params)
        assert out.shape == ref_out.shape and mean_scores.shape == ref_mean.shape
        # Tolerances cover bf16 MXU operands (f32 accumulation) and the EUP
        # approximate softmax reciprocal.
        assert jnp.allclose(out, ref_out, atol=4e-2, rtol=4e-2), \
            f"output mismatch (D={D})"
        assert jnp.allclose(mean_scores, ref_mean, atol=1e-2, rtol=1e-2), \
            f"mean-scores mismatch (D={D})"

    print("KERNEL_OK")
</pallas_src>

<mosaic_0001>
module attributes {stable_mosaic.version = 11 : i64} {
  func.func @_fused_qkv_kernel(%arg0: i32, %arg1: memref<2x8x96xbf16, #tpu.memory_space<vmem>>, %arg2: memref<96x96xbf16, #tpu.memory_space<vmem>>, %arg3: memref<1x96xf32, #tpu.memory_space<vmem>>, %arg4: memref<32x32xbf16, #tpu.memory_space<vmem>>, %arg5: memref<1x32xf32, #tpu.memory_space<vmem>>, %arg6: memref<2x8x32xf32, #tpu.memory_space<vmem>>, %arg7: memref<2x8xf32, #tpu.memory_space<vmem>>) attributes {dimension_semantics = [#tpu.dimension_semantics<arbitrary>], iteration_bounds = array<i64: 1>, scalar_prefetch = 0 : i64, scratch_operands = 0 : i64, tpu.core_type = #tpu.core_type<tc>, window_params = [{transform_indices = @transform_0, window_bounds = array<i64: 2, 8, 96>}, {pipeline_mode = #tpu.pipeline_mode<synchronous>, transform_indices = @transform_1, window_bounds = array<i64: 96, 96>}, {pipeline_mode = #tpu.pipeline_mode<synchronous>, transform_indices = @transform_2, window_bounds = array<i64: 1, 96>}, {pipeline_mode = #tpu.pipeline_mode<synchronous>, transform_indices = @transform_3, window_bounds = array<i64: 32, 32>}, {pipeline_mode = #tpu.pipeline_mode<synchronous>, transform_indices = @transform_4, window_bounds = array<i64: 1, 32>}, {transform_indices = @transform_5, window_bounds = array<i64: 2, 8, 32>}, {transform_indices = @transform_6, window_bounds = array<i64: 2, 8>}]} {
    %c0 = arith.constant 0 : index
    %c0_0 = arith.constant 0 : index
    %c0_1 = arith.constant 0 : index
    %0 = vector.load %arg1[%c0, %c0_0, %c0_1] : memref<2x8x96xbf16, #tpu.memory_space<vmem>>, vector<2x8x96xbf16>
    %1 = vector.shape_cast %0 : vector<2x8x96xbf16> to vector<16x96xbf16>
    %c0_2 = arith.constant 0 : index
    %c0_3 = arith.constant 0 : index
    %2 = vector.load %arg2[%c0_2, %c0_3] : memref<96x96xbf16, #tpu.memory_space<vmem>>, vector<96x96xbf16>
    %cst = arith.constant dense<0.000000e+00> : vector<16x96xf32>
    %3 = tpu.matmul %1, %2, %cst {dimension_numbers = #tpu.dot_dimension_numbers<[1], [0], [0], [1], [0, 0, 1, 1], [], []>} : vector<16x96xbf16>, vector<96x96xbf16>, vector<16x96xf32> -> vector<16x96xf32>
    %c0_4 = arith.constant 0 : index
    %c0_5 = arith.constant 0 : index
    %4 = vector.load %arg3[%c0_4, %c0_5] : memref<1x96xf32, #tpu.memory_space<vmem>>, vector<1x96xf32>
    %5 = vector.broadcast %4 : vector<1x96xf32> to vector<16x96xf32>
    %6 = arith.addf %3, %5 : vector<16x96xf32>
    %7 = vector.shape_cast %6 : vector<16x96xf32> to vector<2x8x96xf32>
    %8 = vector.extract_strided_slice %7 {offsets = [0, 0, 0], sizes = [2, 8, 32], strides = [1, 1, 1]} : vector<2x8x96xf32> to vector<2x8x32xf32>
    %9 = arith.truncf %8 : vector<2x8x32xf32> to vector<2x8x32xbf16>
    %10 = vector.extract_strided_slice %7 {offsets = [0, 0, 32], sizes = [2, 8, 32], strides = [1, 1, 1]} : vector<2x8x96xf32> to vector<2x8x32xf32>
    %11 = arith.truncf %10 : vector<2x8x32xf32> to vector<2x8x32xbf16>
    %12 = vector.extract_strided_slice %7 {offsets = [0, 0, 64], sizes = [2, 8, 32], strides = [1, 1, 1]} : vector<2x8x96xf32> to vector<2x8x32xf32>
    %13 = arith.truncf %12 : vector<2x8x32xf32> to vector<2x8x32xbf16>
    %cst_6 = arith.constant dense<0.000000e+00> : vector<2x8x8xf32>
    %14 = tpu.matmul %9, %11, %cst_6 {dimension_numbers = #tpu.dot_dimension_numbers<[2], [2], [1], [1], [0, 0, 0, 1, 1, 1], [0], [0]>} : vector<2x8x32xbf16>, vector<2x8x32xbf16>, vector<2x8x8xf32> -> vector<2x8x8xf32>
    %cst_7 = arith.constant dense<0xFF800000> : vector<2x8xf32>
    %15 = vector.multi_reduction <maximumf>, %14, %cst_7 [2] : vector<2x8x8xf32> to vector<2x8xf32>
    %16 = vector.shape_cast %15 : vector<2x8xf32> to vector<2x8x1xf32>
    %17 = vector.broadcast %16 : vector<2x8x1xf32> to vector<2x8x8xf32>
    %18 = arith.subf %14, %17 : vector<2x8x8xf32>
    %19 = math.exp %18 : vector<2x8x8xf32>
    %cst_8 = arith.constant dense<0.000000e+00> : vector<2x8xf32>
    %20 = vector.multi_reduction <add>, %19, %cst_8 [2] : vector<2x8x8xf32> to vector<2x8xf32>
    %21 = vector.shape_cast %20 : vector<2x8xf32> to vector<2x8x1xf32>
    %22 = tpu.reciprocal %21 {approx = true} : vector<2x8x1xf32> -> vector<2x8x1xf32>
    %23 = vector.broadcast %22 : vector<2x8x1xf32> to vector<2x8x8xf32>
    %24 = arith.mulf %19, %23 : vector<2x8x8xf32>
    %25 = arith.truncf %24 : vector<2x8x8xf32> to vector<2x8x8xbf16>
    %cst_9 = arith.constant dense<0.000000e+00> : vector<2x8x32xf32>
    %26 = tpu.matmul %25, %13, %cst_9 {dimension_numbers = #tpu.dot_dimension_numbers<[2], [1], [1], [2], [0, 0, 0, 1, 1, 2], [0], [0]>} : vector<2x8x8xbf16>, vector<2x8x32xbf16>, vector<2x8x32xf32> -> vector<2x8x32xf32>
    %27 = vector.shape_cast %26 : vector<2x8x32xf32> to vector<16x32xf32>
    %28 = arith.truncf %27 : vector<16x32xf32> to vector<16x32xbf16>
    %c0_10 = arith.constant 0 : index
    %c0_11 = arith.constant 0 : index
    %29 = vector.load %arg4[%c0_10, %c0_11] : memref<32x32xbf16, #tpu.memory_space<vmem>>, vector<32x32xbf16>
    %cst_12 = arith.constant dense<0.000000e+00> : vector<16x32xf32>
    %30 = tpu.matmul %28, %29, %cst_12 {dimension_numbers = #tpu.dot_dimension_numbers<[1], [0], [0], [1], [0, 0, 1, 1], [], []>} : vector<16x32xbf16>, vector<32x32xbf16>, vector<16x32xf32> -> vector<16x32xf32>
    %c0_13 = arith.constant 0 : index
    %c0_14 = arith.constant 0 : index
    %31 = vector.load %arg5[%c0_13, %c0_14] : memref<1x32xf32, #tpu.memory_space<vmem>>, vector<1x32xf32>
    %32 = vector.broadcast %31 : vector<1x32xf32> to vector<16x32xf32>
    %33 = arith.addf %30, %32 : vector<16x32xf32>
    %34 = vector.shape_cast %33 : vector<16x32xf32> to vector<2x8x32xf32>
    %c0_15 = arith.constant 0 : index
    %c0_16 = arith.constant 0 : index
    %c0_17 = arith.constant 0 : index
    %35 = vector.load %arg6[%c0_15, %c0_16, %c0_17] : memref<2x8x32xf32, #tpu.memory_space<vmem>>, vector<2x8x32xf32>
    tpu.vector_store %arg6[%c0_15, %c0_16, %c0_17], %34 {strides = array<i32>} : memref<2x8x32xf32, #tpu.memory_space<vmem>>, vector<2x8x32xf32>,
    %cst_18 = arith.constant dense<0.000000e+00> : vector<2x8xf32>
    %36 = vector.multi_reduction <add>, %24, %cst_18 [1] : vector<2x8x8xf32> to vector<2x8xf32>
    %cst_19 = arith.constant 1.250000e-01 : f32
    %37 = vector.broadcast %cst_19 : f32 to vector<2x8xf32>
    %38 = arith.mulf %36, %37 : vector<2x8xf32>
    %c0_20 = arith.constant 0 : index
    %c0_21 = arith.constant 0 : index
    %39 = vector.load %arg7[%c0_20, %c0_21] : memref<2x8xf32, #tpu.memory_space<vmem>>, vector<2x8xf32>
    tpu.vector_store %arg7[%c0_20, %c0_21], %38 {strides = array<i32>} : memref<2x8xf32, #tpu.memory_space<vmem>>, vector<2x8xf32>,
    return
  }
  func.func @transform_0(%arg0: i32) -> (i32, i32, i32) {
    %c0_i32 = arith.constant 0 : i32
    %c0_i32_0 = arith.constant 0 : i32
    %c0_i32_1 = arith.constant 0 : i32
    return %arg0, %c0_i32, %c0_i32_0 : i32, i32, i32
  }
  func.func @transform_1(%arg0: i32) -> (i32, i32) {
    %c0_i32 = arith.constant 0 : i32
    %c0_i32_0 = arith.constant 0 : i32
    %c0_i32_1 = arith.constant 0 : i32
    return %c0_i32, %c0_i32_0 : i32, i32
  }
  func.func @transform_2(%arg0: i32) -> (i32, i32) {
    %c0_i32 = arith.constant 0 : i32
    %c0_i32_0 = arith.constant 0 : i32
    %c0_i32_1 = arith.constant 0 : i32
    return %c0_i32, %c0_i32_0 : i32, i32
  }
  func.func @transform_3(%arg0: i32) -> (i32, i32) {
    %c0_i32 = arith.constant 0 : i32
    %c0_i32_0 = arith.constant 0 : i32
    %c0_i32_1 = arith.constant 0 : i32
    return %c0_i32, %c0_i32_0 : i32, i32
  }
  func.func @transform_4(%arg0: i32) -> (i32, i32) {
    %c0_i32 = arith.constant 0 : i32
    %c0_i32_0 = arith.constant 0 : i32
    %c0_i32_1 = arith.constant 0 : i32
    return %c0_i32, %c0_i32_0 : i32, i32
  }
  func.func @transform_5(%arg0: i32) -> (i32, i32, i32) {
    %c0_i32 = arith.constant 0 : i32
    %c0_i32_0 = arith.constant 0 : i32
    %c0_i32_1 = arith.constant 0 : i32
    return %arg0, %c0_i32, %c0_i32_0 : i32, i32, i32
  }
  func.func @transform_6(%arg0: i32) -> (i32, i32) {
    %c0_i32 = arith.constant 0 : i32
    %c0_i32_0 = arith.constant 0 : i32
    return %arg0, %c0_i32 : i32, i32
  }
}

</mosaic_0001>

<bundles_post_ra>
// kernel: tpu_custom_call.1
= control target key start
LH: loop header
LB: loop body
LE: loop exit
PB: predicated region body
PF: predicated region fallthrough
CT: control target
= control target key end

     0   :  { %12 = vsyncpa [#allocation3], 0  ;;  %s655_s0 = inlined_call_operand.hbm [shape: bf16[2,8,96], index: 0, kind: input, shape index: {}]   ;;  %s656_s1 = inlined_call_operand.hbm [shape: bf16[96,96], index: 1, kind: input, shape index: {}]   ;;  %s657_s2 = inlined_call_operand.vmem [shape: f32[1,96], index: 2, kind: input, shape index: {}]   ;;  %s658_s3 = inlined_call_operand.hbm [shape: bf16[32,32], index: 3, kind: input, shape index: {}]   ;;  %s659_s4 = inlined_call_operand.vmem [shape: f32[1,32], index: 4, kind: input, shape index: {}]   ;;  %s660_s5 = inlined_call_operand.hbm [shape: f32[2,8,32], index: 5, kind: output, shape index: {0}]   ;;  %s661_s6 = inlined_call_operand.hbm [shape: f32[2,8], index: 6, kind: output, shape index: {1}]  }
   0x1   :  { %13 = vsyncpa [#allocation6], 0 }
   0x2   :  { %14 = vsyncpa [#allocation4], 0 }
   0x3   :  { %15 = vsyncpa [#allocation10], 0  ;;  %s33_s23 = sshll.u32 %s656_s1, 4  ;;  %s566_s24 = smov [#allocation5]   ;;  %s34_s23 = int_to_ptr.hbm [resolvable:$true] %s33_s23 }
   0x4   :  { %s35_s25 = sshll.u32 %s566_s24, 4  ;;  %s20_s28 = sshll.u32 %s655_s0, 4  ;;  %s36_s25 = int_to_ptr.vmem [resolvable:$true] %s35_s25  ;;  %s21_s28 = int_to_ptr.hbm [resolvable:$true] %s20_s28 }
   0x5   :  { %s567_s29 = smov 64   ;;  %s568_s30 = smov 4  }
   0x6   :  { %41 = dma.hbm_to_vmem [thread:$0]  %s34_s23, 768, %s36_s25, [#allocation6], %s567_s29, %s567_s29, %s568_s30  }
   0x7   :  { %s569_s7 = smov [#allocation2]   ;;  %s48_s1 = sshll.u32 %s658_s3, 4  ;;  %s49_s1 = int_to_ptr.hbm [resolvable:$true] %s48_s1 }
   0x8   :  { %s22_s8 = sshll.u32 %s569_s7, 4  ;;  %s570_s11 = smov [#allocation7]   ;;  %s23_s8 = int_to_ptr.vmem [resolvable:$true] %s22_s8 }
   0x9   :  { %28 = dma.hbm_to_vmem [thread:$0]  %s21_s28, 128, %s23_s8, [#allocation3], %s567_s29, %s567_s29, %s568_s30  }
   0xa   :  { %s50_s12 = sshll.u32 %s570_s11, 4  ;;  %s51_s12 = int_to_ptr.vmem [resolvable:$true] %s50_s12 }
   0xb   :  { %56 = dma.hbm_to_vmem [thread:$0]  %s49_s1, 256, %s51_s12, [#allocation6], %s567_s29, %s567_s29, %s568_s30  }
   0xc   :  { %558 = dma.done.wait [#allocation3], 128  }
   0xd   :  { %559 = vsyncadd [#allocation3], 4294967168 }
   0xe   :  { %560 = dma.done.wait [#allocation6], 1024  }
   0xf   :  { %561 = vsyncadd [#allocation6], 4294966272  ;;  %v415_v0 = vld [vmem:[#allocation5 + $0x28] sm:$0xff]  ;;  %v414_v1 = vld [vmem:[#allocation5 + $0x20] sm:$0xff]  ;;  %vm131_vm0 = vcmask 785408   ;;  %s571_s13 = smov 96  }
  0x10   :  { %137 = vmatpush.bf16.msra.mxu0 %v415_v0  ;;  %v413_v2 = vld [vmem:[#allocation5 + $0x18] sm:$0xff]  ;;  %v412_v3 = vld [vmem:[#allocation5 + $0x10] sm:$0xff]  ;;  %v411_v4 = vld [vmem:[#allocation5 + $0x8] sm:$0xff]  ;;  %vm156_vm1 = vcmask 261120   ;;  %vm200_vm2 = vcmask 64512   ;;  %vm230_vm3 = vcmask 1043456  }
  0x11   :  { %v410_v5 = vld [vmem:[#allocation5] sm:$0xff]  ;;  %v409_v6 = vld [vmem:[#allocation2] sm:$0xff]  ;;  %vm326_vm4 = vcmask 1041409   ;;  %vm329_vm5 = vcmask 58368   ;;  %s351_s17 = sshll.u32 %s661_s6, 4  ;;  %s573_s20 = smov [#allocation8]   ;;  %s352_s17 = int_to_ptr.hbm [resolvable:$true] %s351_s17 }
  0x12   :  { %v428_v7 = vld [vmem:[%s657_s2] ss:$0 sm:$0xff]  ;;  %s572_s2 = smov [#allocation9]   ;;  %s335_s21 = sshll.u32 %s573_s20, 4  ;;  %s336_s21 = int_to_ptr.vmem [resolvable:$true] %s335_s21 }
  0x13   :  { %s349_s14 = sshll.u32 %s572_s2, 4  ;;  %s337_s24 = sshll.u32 %s660_s5, 4  ;;  %s350_s14 = int_to_ptr.vmem [resolvable:$true] %s349_s14  ;;  %s338_s24 = int_to_ptr.hbm [resolvable:$true] %s337_s24 }
  0x14   :  { %138 = vmatpush.bf16.msra.mxu0 %v414_v1  ;;  %s574_s6 = smov 128   ;;  %s575_s25 = smov 8  }
  0x18   :  { %139 = vmatpush.bf16.msra.mxu0 %v413_v2 }
  0x1c   :  { %140 = vmatpush.bf16.msra.mxu0 %v412_v3  ;;  %v417_v3 = vld [vmem:[#allocation7 + $0x8] sm:$0xff] }
  0x20   :  { %141 = vmatpush.bf16.msra.mxu0 %v411_v4  ;;  %v416_v4 = vld [vmem:[#allocation7] sm:$0xff] }
  0x24   :  { %142 = vmatpush.bf16.msra.mxu0 %v410_v5 }
  0x27   :  { %395 = vmatmul.msk.bf16.vlgmr.msra.gmra.mxu0 %vm131_vm0, %v409_v6 }
  0xa4   :  { %v144_v8 = vpop.f32.mrf.mxu0 }
  0xa5   :  { %v145_v9 = vadd.f32 %v428_v7, %v144_v8 }
  0xa7   :  { %v149_v10 = vpack.c.bf16 %v145_v9, %v145_v9 }
  0xa9   :  { %v152_v11 = vunpack.c.l.b16 %v149_v10 }
  0xab   :  { %v153_v12 = vpack.c.b16 %v152_v11, %v152_v11 }
  0xac   :  { %v146_v13 = vpop.f32.mrf.mxu0 }
  0xad   :  { %v147_v14 = vadd.f32 %v428_v7, %v146_v13  ;;  %154 = vrot.lane.b32.xlu0 %v153_v12, %s571_s13 }
  0xaf   :  { %v150_v15 = vpack.c.bf16 %v147_v14, %v147_v14 }
  0xb1   :  { %v177_v16 = vunpack.c.l.b16 %v150_v15 }
  0xb3   :  { %v178_v17 = vpack.c.b16 %v177_v16, %v177_v16 }
  0xb5   :  { %179 = vrot.lane.b32.xlu0 %v178_v17, %s571_s13 }
 0x11f   :  { %v155_v18 = vpop.permute.xlu0 %154 }
 0x120   :  { %v161_v19 = vsel %vm156_vm1, %v155_v18, 0 }
 0x121   :  { %170 = vmatpush.bf16.xpose.msra.mxu1 %v161_v19 }
 0x127   :  { %v180_v20 = vpop.permute.xlu0 %179 }
 0x128   :  { %396 = vmatmul.msk.bf16.vlgmr.msra.gmra.mxu1 %vm156_vm1, %v149_v10  ;;  %v185_v21 = vsel %vm156_vm1, %v180_v20, 0  ;;  %v429_v10 = vld [vmem:[%s659_s4] ss:$0 sm:$0xff] }
 0x129   :  { %194 = vmatpush.bf16.xpose.msra.mxu2 %v185_v21  ;;  %298 = vmatpush.bf16.msrb.mxu1 %v417_v3 }
 0x12d   :  { %299 = vmatpush.bf16.msrb.mxu1 %v416_v4 }
 0x130   :  { %397 = vmatmul.msk.bf16.vlgmr.msra.gmra.mxu2 %vm156_vm1, %v150_v15 }
 0x1a5   :  { %v172_v22 = vpop.f32.mrf.mxu1 }
 0x1a6   :  { %v201_v23 = vsel %vm200_vm2, %v172_v22, -inf }
 0x1a7   :  { %202 = vmax.xlane.f32.xlu1 %v201_v23 }
 0x1ad   :  { %v174_v24 = vpop.f32.mrf.mxu1 }
 0x1b3   :  { %v196_v25 = vpop.f32.mrf.mxu2 }
 0x1b4   :  { %v204_v26 = vsel %vm200_vm2, %v196_v25, -inf }
 0x1b5   :  { %205 = vmax.xlane.f32.xlu1 %v204_v26 }
 0x1bb   :  { %v198_v27 = vpop.f32.mrf.mxu2 }
 0x1ce   :  { %247 = vrot.lane.b32.xlu1 %v178_v17, %s567_s29 }
 0x21a   :  { %v203_v28 = vpop.xlane.xlu1 %202 }
 0x21b   :  { %v207_v29 = vsub.f32 %v172_v22, %v203_v28 }
 0x21d   :  { %v209_v30 = vmul.f32 1.442695, %v207_v29 }
 0x21f   :  { %430 = vpow2.f32 %v209_v30 }
 0x225   :  { %v431_v31 = vpop.eup %430 }
 0x226   :  { %v213_v32 = vsel %vm200_vm2, %v431_v31, 0.0 }
 0x227   :  { %214 = vadd.xlane.f32.xlu2 %v213_v32 }
 0x228   :  { %v206_v33 = vpop.xlane.xlu1 %205 }
 0x229   :  { %v208_v34 = vsub.f32 %v196_v25, %v206_v33 }
 0x22b   :  { %v211_v35 = vmul.f32 1.442695, %v208_v34 }
 0x22d   :  { %432 = vpow2.f32 %v211_v35 }
 0x233   :  { %v433_v36 = vpop.eup %432 }
 0x234   :  { %v216_v37 = vsel %vm200_vm2, %v433_v36, 0.0 }
 0x235   :  { %217 = vadd.xlane.f32.xlu0 %v216_v37 }
 0x23f   :  { %225 = vrot.lane.b32.xlu2 %v153_v12, %s567_s29 }
 0x240   :  { %v248_v40 = vpop.permute.xlu1 %247 }
 0x241   :  { %v253_v44 = vsel %vm230_vm3, %v248_v40, 0 }
 0x29a   :  { %v215_v38 = vpop.xlane.xlu2 %214 }
 0x29b   :  { %434 = vrcp.f32 %v215_v38 }
 0x2a1   :  { %v435_v39 = vpop.eup %434 }
 0x2a2   :  { %v226_v41 = vpop.permute.xlu2 %225  ;;  %v221_v42 = vmul.f32 %v435_v39, %v431_v31 }
 0x2a3   :  { %v232_v43 = vsel %vm230_vm3, %v226_v41, 0 }
 0x2a4   :  { %241 = vmatpush.bf16.msra.mxu3 %v232_v43  ;;  %v223_v45 = vpack.c.bf16 %v221_v42, %v221_v42  ;;  %v308_v46 = vsel %vm200_vm2, %v221_v42, 0.0 }
 0x2a5   :  { %v309_v47 = vrot.slane %v308_v46, 4 }
 0x2a7   :  { %398 = vmatmul.msk.bf16.vlgmr.msra.gmra.mxu3 %vm200_vm2, %v223_v45  ;;  %v310_v49 = vadd.f32 %v309_v47, %v308_v46 }
 0x2a8   :  { %262 = vmatpush.bf16.msrb.mxu3 %v253_v44  ;;  %v218_v48 = vpop.xlane.xlu0 %217 }
 0x2a9   :  { %436 = vrcp.f32 %v218_v48  ;;  %v311_v51 = vrot.slane %v310_v49, 2 }
 0x2ab   :  { %v312_v54 = vadd.f32 %v311_v51, %v310_v49 }
 0x2ad   :  { %v313_v59 = vrot.slane %v312_v54, 1 }
 0x2af   :  { %v437_v50 = vpop.eup %436  ;;  %v314_v61 = vadd.f32 %v313_v59, %v312_v54 }
 0x2b0   :  { %v222_v52 = vmul.f32 %v437_v50, %v433_v36 }
 0x2b1   :  { %v322_v0 = vmul.f32 0.125, %v314_v61 }
 0x2b2   :  { %v315_v53 = vsel %vm200_vm2, %v222_v52, 0.0  ;;  %v224_v57 = vpack.c.bf16 %v222_v52, %v222_v52 }
 0x2b3   :  { %v316_v55 = vrot.slane %v315_v53, 4 }
 0x2b5   :  { %v317_v56 = vadd.f32 %v316_v55, %v315_v53 }
 0x2b7   :  { %v318_v58 = vrot.slane %v317_v56, 2  ;;  %399 = vmatmul.msk.bf16.vlgmr.msrb.gmra.mxu3 %vm200_vm2, %v224_v57 }
 0x2b9   :  { %v319_v60 = vadd.f32 %v318_v58, %v317_v56 }
 0x2bb   :  { %v320_v62 = vrot.slane %v319_v60, 1 }
 0x2bd   :  { %v321_v63 = vadd.f32 %v320_v62, %v319_v60 }
 0x2bf   :  { %v323_v1 = vmul.f32 0.125, %v321_v63 }
 0x2c1   :  { %v327_v2 = vsel %vm326_vm4, %v323_v1, %v322_v0 }
 0x2c2   :  { %330 = vst.msk [vmem:[#allocation9] sm:$0x3] %vm329_vm5, %v327_v2 }
 0x2c3   :  { %354 = dma.vmem_to_hbm [thread:$0]  %s350_s14, 32, %s352_s17, [#allocation10]  }
 0x32a   :  { %v243_v5 = vpop.f32.mrf.mxu3 }
 0x332   :  { %v245_v6 = vpop.f32.mrf.mxu3 }
 0x33a   :  { %v264_v7 = vpop.f32.mrf.mxu3 }
 0x33b   :  { %v268_v8 = vpack.c.bf16 %v264_v7, %v243_v5 }
 0x33d   :  { %408 = vmatmul.msk.bf16.vlgmr.msrb.gmra.mxu1 %vm156_vm1, %v268_v8 }
 0x342   :  { %v266_v9 = vpop.f32.mrf.mxu3 }
 0x3ba   :  { %v301_v11 = vpop.f32.mrf.mxu1 }
 0x3bb   :  { %v302_v12 = vadd.f32 %v429_v10, %v301_v11 }
 0x3bd   :  { %306 = vst.msk [vmem:[#allocation8] sm:$0xff] %vm156_vm1, %v302_v12 }
 0x3c2   :  { %v303_v13 = vpop.f32.mrf.mxu1 }
 0x3c3   :  { %v304_v14 = vadd.f32 %v429_v10, %v303_v13 }
 0x3c5   :  { %307 = vst.msk [vmem:[#allocation8 + $0x8] sm:$0xff] %vm156_vm1, %v304_v14 }
 0x3c6   :  { %343 = dma.vmem_to_hbm [thread:$0]  %s336_s21, 256, %s338_s24, [#allocation4], %s574_s6, %s574_s6, %s575_s25  }
 0x3c7   :  { %562 = dma.done.wait [#allocation4], 256  }
 0x3c8   :  { %563 = vsyncadd [#allocation4], 4294967040 }
 0x3c9   :  { %564 = dma.done.wait [#allocation10], 32  }
 0x3ca   :  { %565 = vsyncadd [#allocation10], 4294967264 }
 0x3cb   :  { %363 = vsyncpa [#allocation3], 1 }
 0x3cc   :  { %364 = vsyncpa [#allocation6], 1 }
 0x3cd   :  { %365 = vsyncpa [#allocation4], 1 }
 0x3ce   :  { %366 = vsyncpa [#allocation10], 1 }

</bundles_post_ra>
